<compile_context>
chip_gen: v5e
topology: v5e:2x2
jax: 0.10.0
libtpu: 0.0.40
codegen_flags: <defaults>
</compile_context>

<pallas_src>
import functools

import jax
import jax.numpy as jnp
from jax import lax
from jax.experimental import pallas as pl
from jax.experimental.pallas import tpu as pltpu

_LANES = 128
_MAX_BLOCK_B = 512  # keeps the (32, TB) hidden activation small in vregs


def _round_up(n, m):
    return ((n + m - 1) // m) * m


def pack_actor_params(w1, b1, w2, b2):
    """Pack params once (outside the hot path) into two MXU-ready f32 panels.

    Math convention y = x @ w + b (i.e. w1 = fc1.weight.T, etc.).
      w1a (HP, SP): rows [0,H) = [w1^T | b1 | 0], row H = e_S (ones-row generator)
      w2a (AP, HP): rows [0,A) = [w2^T | b2 | 0]
    """
    S, H = w1.shape
    H2, A = w2.shape
    assert H2 == H
    SP = _round_up(S + 1, 8)
    HP = _round_up(H + 1, 8)
    AP = _round_up(A, 8)

    w1a = jnp.zeros((HP, SP), jnp.float32)
    w1a = w1a.at[:H, :S].set(w1.T.astype(jnp.float32))
    w1a = w1a.at[:H, S].set(jnp.reshape(b1, (H,)).astype(jnp.float32))
    w1a = w1a.at[H, S].set(1.0)  # makes h[H, :] == 1 -> carries fc2's bias

    w2a = jnp.zeros((AP, HP), jnp.float32)
    w2a = w2a.at[:A, :H].set(w2.T.astype(jnp.float32))
    w2a = w2a.at[:A, H].set(jnp.reshape(b2, (A,)).astype(jnp.float32))
    return w1a, w2a


def actor_kernel(x_ref, w1a_ref, w2a_ref, o_ref, *, action_size):
    # x_ref  : (SP, TB)  rows [0,S) = x^T, row S = 1, rest 0
    # w1a_ref: (HP, SP)  [w1^T | b1] plus the ones-row generator
    # w2a_ref: (AP, HP)  [w2^T | b2]
    # fc1 + ReLU on the MXU; the augmented row stays 1 through ReLU.
    h = jnp.maximum(
        jnp.dot(w1a_ref[...], x_ref[...],
                preferred_element_type=jnp.float32,
                precision=lax.Precision.HIGHEST),
        0.0)                                                        # (HP, TB)
    # fc2 on the MXU; drop the zero padding rows before softmax.
    logits = jnp.dot(w2a_ref[...], h,
                     preferred_element_type=jnp.float32,
                     precision=lax.Precision.HIGHEST)[:action_size, :]  # (A, TB)
    # Exact, max-shifted softmax over the (tiny) sublane axis.
    m = jnp.max(logits, axis=0, keepdims=True)
    e = jnp.exp(logits - m)
    probs = e / jnp.sum(e, axis=0, keepdims=True)
    o_ref[...] = probs.astype(o_ref.dtype)                          # lane-dense store


def actor_forward(x, w1a, w2a, *, action_size, block_b=None):
    """x: (B, state_size) -> (B, action_size) probabilities (== Actor.forward)."""
    B, S = x.shape
    HP, SP = w1a.shape
    AP, HP2 = w2a.shape
    assert HP2 == HP and S + 1 <= SP and action_size <= AP

    B_pad = _round_up(B, _LANES)
    if block_b is None:
        TB = min(B_pad, _MAX_BLOCK_B)          # batch<=512 -> single grid step
    else:
        TB = _round_up(min(block_b, B_pad), _LANES)
    B_pad = _round_up(B_pad, TB)

    # Lane-major augmented input: x^T in rows [0,S), a ones row at S (bias path),
    # zeros elsewhere.  Built once in the thin wrapper; rows are wide & contiguous.
    xT = jnp.zeros((SP, B_pad), jnp.float32)
    xT = xT.at[:S, :B].set(x.T.astype(jnp.float32))
    xT = xT.at[S, :].set(1.0)

    kernel = functools.partial(actor_kernel, action_size=action_size)
    out = pl.pallas_call(
        kernel,
        out_shape=jax.ShapeDtypeStruct((action_size, B_pad), jnp.float32),
        grid=(B_pad // TB,),
        in_specs=[
            pl.BlockSpec((SP, TB), lambda i: (0, i)),
            pl.BlockSpec((HP, SP), lambda i: (0, 0)),   # grid-invariant: one DMA
            pl.BlockSpec((AP, HP), lambda i: (0, 0)),   # grid-invariant: one DMA
        ],
        out_specs=pl.BlockSpec((action_size, TB), lambda i: (0, i)),
        compiler_params=pltpu.CompilerParams(
            dimension_semantics=("parallel",)),
    )(xT, w1a, w2a)
    # (A, B_pad) -> (B, A): cheap wrapper-side transpose back to the module layout.
    return out[:, :B].T


def reference_forward(x, w1, b1, w2, b2):
    h = jnp.maximum(jnp.dot(x, w1, precision=lax.Precision.HIGHEST) + b1, 0.0)
    logits = jnp.dot(h, w2, precision=lax.Precision.HIGHEST) + b2
    return jax.nn.softmax(logits, axis=-1)


if __name__ == "__main__":
    # CartPole Actor sizes: state_size=4, hidden=24, action_size=2.
    batch, state_size, hidden, action_size = 256, 4, 24, 2

    key = jax.random.PRNGKey(0)
    kx, k1, k2, k3, k4 = jax.random.split(key, 5)
    x = jax.random.normal(kx, (batch, state_size), dtype=jnp.float32)

    bound1 = 1.0 / jnp.sqrt(jnp.float32(state_size))
    bound2 = 1.0 / jnp.sqrt(jnp.float32(hidden))
    w1 = jax.random.uniform(k1, (state_size, hidden), jnp.float32, -bound1, bound1)
    b1 = jax.random.uniform(k2, (hidden,), jnp.float32, -bound1, bound1)
    w2 = jax.random.uniform(k3, (hidden, action_size), jnp.float32, -bound2, bound2)
    b2 = jax.random.uniform(k4, (action_size,), jnp.float32, -bound2, bound2)

    # Pack weights once; reuse the panels for every forward step.
    w1a, w2a = pack_actor_params(w1, b1, w2, b2)

    out = jax.block_until_ready(
        actor_forward(x, w1a, w2a, action_size=action_size))   # grid=(1,)
    ref = reference_forward(x, w1, b1, w2, b2)
    assert out.shape == (batch, action_size)
    assert jnp.allclose(out, ref, atol=1e-5, rtol=1e-5)
    assert jnp.allclose(jnp.sum(out, axis=-1), 1.0, atol=1e-5)

    # Generic action_size path (exercises sublane padding of A), 6 actions, batch 32.
    a6 = 6
    k5, k6 = jax.random.split(kx)
    w2b = jax.random.uniform(k5, (hidden, a6), jnp.float32, -bound2, bound2)
    b2b = jax.random.uniform(k6, (a6,), jnp.float32, -bound2, bound2)
    w1a6, w2a6 = pack_actor_params(w1, b1, w2b, b2b)
    x6 = x[:32]
    out6 = jax.block_until_ready(
        actor_forward(x6, w1a6, w2a6, action_size=a6))
    ref6 = reference_forward(x6, w1, b1, w2b, b2b)
    assert jnp.allclose(out6, ref6, atol=1e-5, rtol=1e-5)
    assert jnp.allclose(jnp.sum(out6, axis=-1), 1.0, atol=1e-5)

    print("KERNEL_OK")
</pallas_src>

<mosaic_0001>
module attributes {stable_mosaic.version = 11 : i64} {
  func.func @actor_kernel(%arg0: i32, %arg1: memref<8x256xf32, #tpu.memory_space<vmem>>, %arg2: memref<32x8xf32, #tpu.memory_space<vmem>>, %arg3: memref<8x32xf32, #tpu.memory_space<vmem>>, %arg4: memref<2x256xf32, #tpu.memory_space<vmem>>) attributes {dimension_semantics = [#tpu.dimension_semantics<parallel>], iteration_bounds = array<i64: 1>, scalar_prefetch = 0 : i64, scratch_operands = 0 : i64, tpu.core_type = #tpu.core_type<tc>, window_params = [{transform_indices = @transform_0, window_bounds = array<i64: 8, 256>}, {pipeline_mode = #tpu.pipeline_mode<synchronous>, transform_indices = @transform_1, window_bounds = array<i64: 32, 8>}, {pipeline_mode = #tpu.pipeline_mode<synchronous>, transform_indices = @transform_2, window_bounds = array<i64: 8, 32>}, {transform_indices = @transform_3, window_bounds = array<i64: 2, 256>}]} {
    %c0 = arith.constant 0 : index
    %c0_0 = arith.constant 0 : index
    %0 = vector.load %arg2[%c0, %c0_0] : memref<32x8xf32, #tpu.memory_space<vmem>>, vector<32x8xf32>
    %c0_1 = arith.constant 0 : index
    %c0_2 = arith.constant 0 : index
    %1 = vector.load %arg1[%c0_1, %c0_2] : memref<8x256xf32, #tpu.memory_space<vmem>>, vector<8x256xf32>
    %cst = arith.constant dense<0.000000e+00> : vector<32x256xf32>
    %2 = tpu.matmul %0, %1, %cst {dimension_numbers = #tpu.dot_dimension_numbers<[1], [0], [0], [1], [0, 0, 1, 1], [], []>, precision = #tpu.contract_precision<fp32>} : vector<32x8xf32>, vector<8x256xf32>, vector<32x256xf32> -> vector<32x256xf32>
    %cst_3 = arith.constant 0.000000e+00 : f32
    %3 = vector.broadcast %cst_3 : f32 to vector<32x256xf32>
    %4 = arith.maximumf %2, %3 : vector<32x256xf32>
    %c0_4 = arith.constant 0 : index
    %c0_5 = arith.constant 0 : index
    %5 = vector.load %arg3[%c0_4, %c0_5] : memref<8x32xf32, #tpu.memory_space<vmem>>, vector<8x32xf32>
    %cst_6 = arith.constant dense<0.000000e+00> : vector<8x256xf32>
    %6 = tpu.matmul %5, %4, %cst_6 {dimension_numbers = #tpu.dot_dimension_numbers<[1], [0], [0], [1], [0, 0, 1, 1], [], []>, precision = #tpu.contract_precision<fp32>} : vector<8x32xf32>, vector<32x256xf32>, vector<8x256xf32> -> vector<8x256xf32>
    %7 = vector.extract_strided_slice %6 {offsets = [0, 0], sizes = [2, 256], strides = [1, 1]} : vector<8x256xf32> to vector<2x256xf32>
    %cst_7 = arith.constant dense<0xFF800000> : vector<256xf32>
    %8 = vector.multi_reduction <maximumf>, %7, %cst_7 [0] : vector<2x256xf32> to vector<256xf32>
    %9 = vector.shape_cast %8 : vector<256xf32> to vector<1x256xf32>
    %10 = vector.broadcast %9 : vector<1x256xf32> to vector<2x256xf32>
    %11 = arith.subf %7, %10 : vector<2x256xf32>
    %12 = math.exp %11 : vector<2x256xf32>
    %cst_8 = arith.constant dense<0.000000e+00> : vector<256xf32>
    %13 = vector.multi_reduction <add>, %12, %cst_8 [0] : vector<2x256xf32> to vector<256xf32>
    %14 = vector.shape_cast %13 : vector<256xf32> to vector<1x256xf32>
    %15 = vector.broadcast %14 : vector<1x256xf32> to vector<2x256xf32>
    %16 = arith.divf %12, %15 : vector<2x256xf32>
    %c0_9 = arith.constant 0 : index
    %c0_10 = arith.constant 0 : index
    %17 = vector.load %arg4[%c0_9, %c0_10] : memref<2x256xf32, #tpu.memory_space<vmem>>, vector<2x256xf32>
    tpu.vector_store %arg4[%c0_9, %c0_10], %16 {strides = array<i32>} : memref<2x256xf32, #tpu.memory_space<vmem>>, vector<2x256xf32>,
    return
  }
  func.func @transform_0(%arg0: i32) -> (i32, i32) {
    %c0_i32 = arith.constant 0 : i32
    %c0_i32_0 = arith.constant 0 : i32
    return %c0_i32, %arg0 : i32, i32
  }
  func.func @transform_1(%arg0: i32) -> (i32, i32) {
    %c0_i32 = arith.constant 0 : i32
    %c0_i32_0 = arith.constant 0 : i32
    %c0_i32_1 = arith.constant 0 : i32
    return %c0_i32, %c0_i32_0 : i32, i32
  }
  func.func @transform_2(%arg0: i32) -> (i32, i32) {
    %c0_i32 = arith.constant 0 : i32
    %c0_i32_0 = arith.constant 0 : i32
    %c0_i32_1 = arith.constant 0 : i32
    return %c0_i32, %c0_i32_0 : i32, i32
  }
  func.func @transform_3(%arg0: i32) -> (i32, i32) {
    %c0_i32 = arith.constant 0 : i32
    %c0_i32_0 = arith.constant 0 : i32
    return %c0_i32, %arg0 : i32, i32
  }
}

</mosaic_0001>

<bundles_post_ra>
// kernel: tpu_custom_call.1
= control target key start
LH: loop header
LB: loop body
LE: loop exit
PB: predicated region body
PF: predicated region fallthrough
CT: control target
= control target key end

     0   :  { %vm21_vm0 = vcmask 64512   ;;  %s1179_s0 = inlined_call_operand.vmem [shape: f32[8,256], index: 0, kind: input, shape index: {}]   ;;  %s1180_s1 = inlined_call_operand.vmem [shape: f32[32,8], index: 1, kind: input, shape index: {}]   ;;  %s1181_s2 = inlined_call_operand.vmem [shape: f32[8,32], index: 2, kind: input, shape index: {}]   ;;  %s1182_s3 = inlined_call_operand.hbm [shape: f32[2,256], index: 3, kind: output, shape index: {}]  }
   0x1   :  { %v19_v0 = vld [vmem:[%s1179_s0] sm:$0xff]  ;;  %v20_v2 = vld [vmem:[%s1179_s0 + $0x8] sm:$0xff]  ;;  %v17_v9 = vld [vmem:[%s1180_s1 + $0x10] sm:$0xff] }
   0x2   :  { %v15_v1 = vld [vmem:[%s1180_s1] sm:$0xff]  ;;  %v49_v3 = vand.u32 4294901760, %v19_v0  ;;  %v288_v5 = vand.u32 4294901760, %v20_v2  ;;  %v16_v6 = vld [vmem:[%s1180_s1 + $0x8] sm:$0xff] }
   0x3   :  { %v23_v4 = vsel %vm21_vm0, %v15_v1, 0  ;;  %v26_v8 = vsel %vm21_vm0, %v16_v6, 0 }
   0x4   :  { %v1051_v7 = vand.u32 4294901760, %v23_v4 }
   0x5   :  { %8 = vsyncpa [#allocation3], 0  ;;  %v100_v10 = vsub.f32 %v19_v0, %v49_v3  ;;  %177 = vmatpush.msra.mxu3 %v49_v3  ;;  %50 = vmatpush.msra.mxu0 %v49_v3  ;;  %v339_v11 = vsub.f32 %v20_v2, %v288_v5  ;;  %v1057_v12 = vand.u32 4294901760, %v26_v8  ;;  %v29_v17 = vsel %vm21_vm0, %v17_v9, 0  ;;  %v18_v27 = vld [vmem:[%s1180_s1 + $0x18] sm:$0xff]  ;;  %s973_s27 = sshll.u32 %s1182_s3, 4  ;;  %s974_s27 = int_to_ptr.hbm [resolvable:$true] %s973_s27 }
   0x6   :  { %v1060_v13 = vsub.f32 %v23_v4, %v1051_v7  ;;  %v67_v23 = vand.u32 4294901760, %v29_v17  ;;  %v32_v30 = vsel %vm21_vm0, %v18_v27, 0  ;;  %vm521_vm1 = vcmask 261120  }
   0x7   :  { %139 = vmatpush.msra.mxu2 %v100_v10  ;;  %v101_v14 = vand.u32 4294901760, %v100_v10  ;;  %v340_v15 = vand.u32 4294901760, %v339_v11  ;;  %v1063_v16 = vsub.f32 %v26_v8, %v1057_v12  ;;  %v75_v33 = vand.u32 4294901760, %v32_v30 }
   0x8   :  { %142 = vmatmul.f32.vlgmr.msra.gmra.mxu2 %v1060_v13  ;;  %v1068_v18 = vand.u32 4294901760, %v1060_v13  ;;  %v68_v29 = vsub.f32 %v29_v17, %v67_v23  ;;  %vm895_vm2 = vcmask 1041408  }
   0x9   :  { %v102_v19 = vsub.f32 %v100_v10, %v101_v14  ;;  %289 = vmatpush.msrb.mxu2 %v288_v5  ;;  %221 = vmatpush.msrb.mxu0 %v101_v14  ;;  %v341_v20 = vsub.f32 %v339_v11, %v340_v15  ;;  %v61_v22 = vand.u32 4294901760, %v1063_v16  ;;  %v76_v35 = vsub.f32 %v32_v30, %v75_v33 }
   0xa   :  { %181 = vmatmul.f32.vlgmr.msra.gmra.mxu3 %v1068_v18  ;;  %v54_v21 = vsub.f32 %v1060_v13, %v1068_v18  ;;  %v69_v32 = vand.u32 4294901760, %v68_v29 }
   0xb   :  { %460 = vmatpush.msra.mxu2 %v340_v15  ;;  %v103_v24 = vand.u32 4294901760, %v102_v19  ;;  %v342_v25 = vand.u32 4294901760, %v341_v20  ;;  %v62_v28 = vsub.f32 %v1063_v16, %v61_v22  ;;  %v77_v37 = vand.u32 4294901760, %v76_v35 }
   0xc   :  { %v55_v26 = vand.u32 4294901760, %v54_v21  ;;  %v70_v34 = vsub.f32 %v68_v29, %v69_v32 }
   0xd   :  { %104 = vmatpush.msra.mxu1 %v103_v24  ;;  %343 = vmatpush.msrb.mxu3 %v342_v25  ;;  %v63_v31 = vand.u32 4294901760, %v62_v28  ;;  %v78_v38 = vsub.f32 %v76_v35, %v77_v37 }
   0xe   :  { %56 = vmatmul.f32.vlgmr.msra.gmra.mxu0 %v55_v26  ;;  %106 = vmatmul.f32.vlgmr.msra.gmra.mxu1 %v1051_v7  ;;  %v71_v36 = vand.u32 4294901760, %v70_v34 }
   0xf   :  { %255 = vmatpush.msrb.mxu1 %v49_v3  ;;  %378 = vmatpush.msra.mxu0 %v339_v11  ;;  %v79_v39 = vand.u32 4294901760, %v78_v38 }
  0x10   :  { %147 = vmatmul.f32.gmra.mxu2 %v1063_v16  ;;  %494 = vmatpush.msra.mxu3 %v288_v5 }
  0x11   :  { %416 = vmatpush.msra.mxu1 %v288_v5 }
  0x12   :  { %187 = vmatmul.f32.gmra.mxu3 %v61_v22 }
  0x16   :  { %64 = vmatmul.f32.gmra.mxu0 %v63_v31  ;;  %110 = vmatmul.f32.gmra.mxu1 %v1057_v12 }
  0x18   :  { %152 = vmatmul.f32.gmra.mxu2 %v68_v29 }
  0x1a   :  { %193 = vmatmul.f32.gmra.mxu3 %v69_v32 }
  0x1e   :  { %72 = vmatmul.f32.gmra.mxu0 %v71_v36  ;;  %114 = vmatmul.f32.gmra.mxu1 %v67_v23 }
  0x20   :  { %157 = vmatmul.f32.gmra.mxu2 %v76_v35 }
  0x22   :  { %199 = vmatmul.f32.gmra.mxu3 %v77_v37 }
  0x26   :  { %80 = vmatmul.f32.gmra.mxu0 %v79_v39  ;;  %118 = vmatmul.f32.gmra.mxu1 %v75_v33 }
  0x28   :  { %295 = vmatmul.f32.vlgmr.msrb.gmra.mxu2 %v55_v26 }
  0x2a   :  { %345 = vmatmul.f32.vlgmr.msrb.gmra.mxu3 %v1051_v7 }
  0x2e   :  { %223 = vmatmul.f32.vlgmr.msrb.gmra.mxu0 %v1051_v7  ;;  %257 = vmatmul.f32.vlgmr.msrb.gmra.mxu1 %v1051_v7 }
  0x30   :  { %303 = vmatmul.f32.gmra.mxu2 %v63_v31 }
  0x32   :  { %349 = vmatmul.f32.gmra.mxu3 %v1057_v12 }
  0x36   :  { %227 = vmatmul.f32.gmra.mxu0 %v1057_v12  ;;  %261 = vmatmul.f32.gmra.mxu1 %v1057_v12 }
  0x38   :  { %311 = vmatmul.f32.gmra.mxu2 %v71_v36 }
  0x3a   :  { %353 = vmatmul.f32.gmra.mxu3 %v67_v23 }
  0x3e   :  { %231 = vmatmul.f32.gmra.mxu0 %v67_v23  ;;  %265 = vmatmul.f32.gmra.mxu1 %v67_v23 }
  0x40   :  { %319 = vmatmul.f32.gmra.mxu2 %v79_v39 }
  0x42   :  { %357 = vmatmul.f32.gmra.mxu3 %v75_v33 }
  0x46   :  { %235 = vmatmul.f32.gmra.mxu0 %v75_v33  ;;  %269 = vmatmul.f32.gmra.mxu1 %v75_v33 }
  0x48   :  { %462 = vmatmul.f32.vlgmr.msra.gmra.mxu2 %v1051_v7 }
  0x4a   :  { %496 = vmatmul.f32.vlgmr.msra.gmra.mxu3 %v1051_v7 }
  0x4e   :  { %381 = vmatmul.f32.vlgmr.msra.gmra.mxu0 %v1060_v13  ;;  %420 = vmatmul.f32.vlgmr.msra.gmra.mxu1 %v1068_v18 }
  0x50   :  { %466 = vmatmul.f32.gmra.mxu2 %v1057_v12 }
  0x52   :  { %500 = vmatmul.f32.gmra.mxu3 %v1057_v12 }
  0x56   :  { %386 = vmatmul.f32.gmra.mxu0 %v1063_v16  ;;  %426 = vmatmul.f32.gmra.mxu1 %v61_v22  ;;  %v520_v16 = vld [vmem:[%s1181_s2] sm:$0xff]  ;;  %s1017_s2 = smov [#allocation2]  }
  0x57   :  { %v523_v21 = vsel %vm521_vm1, %v520_v16, 0  ;;  %s971_s24 = sshll.u32 %s1017_s2, 4  ;;  %s972_s24 = int_to_ptr.vmem [resolvable:$true] %s971_s24 }
  0x58   :  { %470 = vmatmul.f32.gmra.mxu2 %v67_v23  ;;  %v1110_v26 = vand.u32 4294901760, %v523_v21 }
  0x5a   :  { %504 = vmatmul.f32.gmra.mxu3 %v67_v23  ;;  %v1121_v36 = vsub.f32 %v523_v21, %v1110_v26 }
  0x5e   :  { %391 = vmatmul.f32.gmra.mxu0 %v68_v29  ;;  %432 = vmatmul.f32.gmra.mxu1 %v69_v32 }
  0x60   :  { %474 = vmatmul.f32.gmra.mxu2 %v75_v33 }
  0x62   :  { %508 = vmatmul.f32.gmra.mxu3 %v75_v33 }
  0x66   :  { %396 = vmatmul.f32.gmra.mxu0 %v76_v35  ;;  %438 = vmatmul.f32.gmra.mxu1 %v77_v37 }
  0x8b   :  { %v57_v40 = vpop.f32.mrf.mxu0  ;;  %v107_v41 = vpop.f32.mrf.mxu1 }
  0x8c   :  { %v143_v42 = vpop.f32.mrf.mxu2  ;;  %v108_v61 = vadd.f32 %v107_v41, %v57_v40 }
  0x8d   :  { %v182_v43 = vpop.f32.mrf.mxu3 }
  0x8e   :  { %v144_v4 = vadd.f32 %v143_v42, %v108_v61  ;;  %v1128_v42 = vand.u32 4294901760, %v1121_v36 }
  0x90   :  { %v183_v7 = vadd.f32 %v182_v43, %v144_v4 }
  0x93   :  { %v65_v44 = vpop.f32.mrf.mxu0  ;;  %v111_v45 = vpop.f32.mrf.mxu1 }
  0x94   :  { %v148_v46 = vpop.f32.mrf.mxu2  ;;  %v112_v60 = vadd.f32 %v111_v45, %v65_v44 }
  0x95   :  { %v188_v47 = vpop.f32.mrf.mxu3 }
  0x96   :  { %v149_v1 = vadd.f32 %v148_v46, %v112_v60 }
  0x98   :  { %v189_v6 = vadd.f32 %v188_v47, %v149_v1 }
  0x9b   :  { %v73_v48 = vpop.f32.mrf.mxu0  ;;  %v115_v49 = vpop.f32.mrf.mxu1 }
  0x9c   :  { %v153_v50 = vpop.f32.mrf.mxu2  ;;  %v116_v62 = vadd.f32 %v115_v49, %v73_v48 }
  0x9d   :  { %v194_v51 = vpop.f32.mrf.mxu3 }
  0x9e   :  { %v154_v5 = vadd.f32 %v153_v50, %v116_v62 }
  0xa0   :  { %v195_v8 = vadd.f32 %v194_v51, %v154_v5 }
  0xa3   :  { %v81_v52 = vpop.f32.mrf.mxu0  ;;  %v119_v53 = vpop.f32.mrf.mxu1 }
  0xa4   :  { %v158_v54 = vpop.f32.mrf.mxu2  ;;  %v120_v9 = vadd.f32 %v119_v53, %v81_v52  ;;  %v548_v52 = vsub.f32 %v1121_v36, %v1128_v42 }
  0xa5   :  { %v200_v55 = vpop.f32.mrf.mxu3 }
  0xa6   :  { %v159_v18 = vadd.f32 %v158_v54, %v120_v9  ;;  %v1140_v60 = vand.u32 4294901760, %v548_v52 }
  0xa8   :  { %v201_v24 = vadd.f32 %v200_v55, %v159_v18 }
  0xab   :  { %v224_v56 = vpop.f32.mrf.mxu0  ;;  %v258_v57 = vpop.f32.mrf.mxu1 }
  0xac   :  { %v1095_v58 = vpop.f32.mrf.mxu2  ;;  %v225_v13 = vadd.f32 %v224_v56, %v183_v7 }
  0xad   :  { %v1097_v59 = vpop.f32.mrf.mxu3 }
  0xae   :  { %v259_v22 = vadd.f32 %v258_v57, %v225_v13 }
  0xb0   :  { %v512_v29 = vmax.f32 %v259_v22, 0.0 }
  0xb2   :  { %v1123_v37 = vand.u32 4294901760, %v512_v29 }
  0xb3   :  { %v228_v63 = vpop.f32.mrf.mxu0  ;;  %v262_v0 = vpop.f32.mrf.mxu1 }
  0xb4   :  { %v1099_v2 = vpop.f32.mrf.mxu2  ;;  %v229_v10 = vadd.f32 %v228_v63, %v189_v6  ;;  %v585_v45 = vsub.f32 %v512_v29, %v1123_v37  ;;  %v347_v6 = vadd.f32 %v1097_v59, %v1095_v58 }
  0xb5   :  { %v1101_v3 = vpop.f32.mrf.mxu3 }
  0xb6   :  { %v263_v19 = vadd.f32 %v262_v0, %v229_v10  ;;  %v586_v55 = vand.u32 4294901760, %v585_v45  ;;  %v351_v63 = vadd.f32 %v1101_v3, %v1099_v2 }
  0xb8   :  { %v514_v25 = vmax.f32 %v263_v19, 0.0  ;;  %v587_v4 = vsub.f32 %v585_v45, %v586_v55 }
  0xba   :  { %v1118_v34 = vand.u32 4294901760, %v514_v25  ;;  %v588_v3 = vand.u32 4294901760, %v587_v4 }
  0xbb   :  { %v232_v11 = vpop.f32.mrf.mxu0  ;;  %v266_v12 = vpop.f32.mrf.mxu1 }
  0xbc   :  { %v233_v14 = vadd.f32 %v232_v11, %v195_v8  ;;  %v1103_v15 = vpop.f32.mrf.mxu2  ;;  %v579_v40 = vsub.f32 %v514_v25, %v1118_v34 }
  0xbd   :  { %v1108_v17 = vpop.f32.mrf.mxu3 }
  0xbe   :  { %v267_v20 = vadd.f32 %v266_v12, %v233_v14  ;;  %v580_v51 = vand.u32 4294901760, %v579_v40  ;;  %v355_v9 = vadd.f32 %v1108_v17, %v1103_v15 }
  0xc0   :  { %v516_v23 = vmax.f32 %v267_v20, 0.0  ;;  %v581_v57 = vsub.f32 %v579_v40, %v580_v51 }
  0xc2   :  { %v1112_v30 = vand.u32 4294901760, %v516_v23  ;;  %v582_v8 = vand.u32 4294901760, %v581_v57 }
  0xc3   :  { %v236_v27 = vpop.f32.mrf.mxu0  ;;  %v270_v28 = vpop.f32.mrf.mxu1 }
  0xc4   :  { %v237_v31 = vadd.f32 %v236_v27, %v201_v24  ;;  %v1114_v32 = vpop.f32.mrf.mxu2  ;;  %v573_v38 = vsub.f32 %v516_v23, %v1112_v30 }
  0xc5   :  { %v1116_v33 = vpop.f32.mrf.mxu3 }
  0xc6   :  { %v271_v35 = vadd.f32 %v270_v28, %v237_v31  ;;  %v574_v48 = vand.u32 4294901760, %v573_v38  ;;  %v359_v15 = vadd.f32 %v1116_v33, %v1114_v32 }
  0xc8   :  { %v518_v39 = vmax.f32 %v271_v35, 0.0  ;;  %v575_v54 = vsub.f32 %v573_v38, %v574_v48 }
  0xca   :  { %v537_v41 = vand.u32 4294901760, %v518_v39  ;;  %v576_v0 = vand.u32 4294901760, %v575_v54 }
  0xcb   :  { %v382_v43 = vpop.f32.mrf.mxu0  ;;  %v421_v44 = vpop.f32.mrf.mxu1 }
  0xcc   :  { %v567_v46 = vsub.f32 %v518_v39, %v537_v41  ;;  %538 = vmatpush.msrb.mxu0 %v537_v41  ;;  %638 = vmatpush.msrb.mxu3 %v537_v41  ;;  %v463_v47 = vpop.f32.mrf.mxu2  ;;  %v383_v2 = vadd.f32 %v382_v43, %v347_v6 }
  0xcd   :  { %v1131_v49 = vpop.f32.mrf.mxu3 }
  0xce   :  { %v568_v50 = vand.u32 4294901760, %v567_v46  ;;  %540 = vmatpush.msrb.mxu0 %v1112_v30  ;;  %609 = vmatpush.msrb.mxu2 %v567_v46  ;;  %v422_v59 = vadd.f32 %v421_v44, %v383_v2 }
  0xcf   :  { %640 = vmatpush.msrb.mxu3 %v1112_v30 }
  0xd0   :  { %v569_v53 = vsub.f32 %v567_v46, %v568_v50  ;;  %542 = vmatpush.msrb.mxu0 %v1118_v34  ;;  %612 = vmatpush.msrb.mxu2 %v573_v38  ;;  %v464_v19 = vadd.f32 %v463_v47, %v422_v59 }
  0xd1   :  { %642 = vmatpush.msrb.mxu3 %v1118_v34 }
  0xd2   :  { %544 = vmatpush.msrb.mxu0 %v1123_v37  ;;  %615 = vmatpush.msrb.mxu2 %v579_v40  ;;  %v570_v56 = vand.u32 4294901760, %v569_v53  ;;  %v498_v24 = vadd.f32 %v1131_v49, %v464_v19 }
  0xd3   :  { %644 = vmatpush.msrb.mxu3 %v1123_v37  ;;  %v387_v61 = vpop.f32.mrf.mxu0  ;;  %v427_v62 = vpop.f32.mrf.mxu1  ;;  %550 = vmatmul.f32.vlgmr.msrb.gmra.mxu0 %v1140_v60 }
  0xd4   :  { %667 = vmatpush.msra.mxu0 %v568_v50  ;;  %571 = vmatpush.msrb.mxu1 %v570_v56  ;;  %v467_v1 = vpop.f32.mrf.mxu2  ;;  %v388_v7 = vadd.f32 %v387_v61, %v351_v63 }
  0xd5   :  { %618 = vmatpush.msrb.mxu2 %v585_v45  ;;  %v501_v5 = vpop.f32.mrf.mxu3  ;;  %648 = vmatmul.f32.vlgmr.msrb.gmra.mxu3 %v1128_v42 }
  0xd6   :  { %671 = vmatpush.msra.mxu0 %v574_v48  ;;  %621 = vmatmul.f32.vlgmr.msrb.gmra.mxu2 %v1121_v36  ;;  %v428_v10 = vadd.f32 %v427_v62, %v388_v7 }
  0xd7   :  { %577 = vmatpush.msrb.mxu1 %v576_v0 }
  0xd8   :  { %675 = vmatpush.msra.mxu0 %v580_v51  ;;  %v468_v16 = vadd.f32 %v467_v1, %v428_v10 }
  0xd9   :  { %583 = vmatpush.msrb.mxu1 %v582_v8 }
  0xda   :  { %679 = vmatpush.msra.mxu0 %v586_v55  ;;  %v502_v17 = vadd.f32 %v501_v5, %v468_v16 }
  0xdb   :  { %589 = vmatpush.msrb.mxu1 %v588_v3  ;;  %v392_v11 = vpop.f32.mrf.mxu0  ;;  %v433_v58 = vpop.f32.mrf.mxu1  ;;  %681 = vmatmul.f32.vlgmr.msra.gmra.mxu0 %v1110_v26 }
  0xdc   :  { %591 = vmatmul.f32.vlgmr.msrb.gmra.mxu1 %v1110_v26  ;;  %v393_v12 = vadd.f32 %v392_v11, %v355_v9  ;;  %v471_v13 = vpop.f32.mrf.mxu2  ;;  %v515_v29 = vmax.f32 %v502_v17, 0.0 }
  0xdd   :  { %698 = vmatpush.msra.mxu1 %v537_v41  ;;  %v505_v14 = vpop.f32.mrf.mxu3 }
  0xde   :  { %v434_v18 = vadd.f32 %v433_v58, %v393_v12  ;;  %v726_v32 = vand.u32 4294901760, %v515_v29 }
  0xdf   :  { %700 = vmatpush.msra.mxu1 %v1112_v30 }
  0xe0   :  { %v472_v20 = vadd.f32 %v471_v13, %v434_v18  ;;  %v764_v41 = vsub.f32 %v515_v29, %v726_v32 }
  0xe1   :  { %702 = vmatpush.msra.mxu1 %v1118_v34  ;;  %v513_v34 = vmax.f32 %v498_v24, 0.0 }
  0xe2   :  { %v506_v21 = vadd.f32 %v505_v14, %v472_v20  ;;  %v765_v48 = vand.u32 4294901760, %v764_v41 }
  0xe3   :  { %704 = vmatpush.msra.mxu1 %v1123_v37  ;;  %v397_v22 = vpop.f32.mrf.mxu0  ;;  %v439_v23 = vpop.f32.mrf.mxu1  ;;  %v728_v39 = vand.u32 4294901760, %v513_v34 }
  0xe4   :  { %706 = vmatmul.f32.vlgmr.msra.gmra.mxu1 %v1110_v26  ;;  %v517_v25 = vmax.f32 %v506_v21, 0.0  ;;  %v398_v27 = vadd.f32 %v397_v22, %v359_v15  ;;  %v475_v28 = vpop.f32.mrf.mxu2  ;;  %v766_v53 = vsub.f32 %v764_v41, %v765_v48 }
  0xe5   :  { %v509_v31 = vpop.f32.mrf.mxu3  ;;  %v770_v44 = vsub.f32 %v513_v34, %v728_v39 }
  0xe6   :  { %v440_v30 = vadd.f32 %v439_v23, %v398_v27  ;;  %v724_v35 = vand.u32 4294901760, %v517_v25  ;;  %v767_v56 = vand.u32 4294901760, %v766_v53 }
  0xe7   :  { %v771_v51 = vand.u32 4294901760, %v770_v44 }
  0xe8   :  { %v476_v38 = vadd.f32 %v475_v28, %v440_v30  ;;  %v758_v40 = vsub.f32 %v517_v25, %v724_v35 }
  0xe9   :  { %v772_v55 = vsub.f32 %v770_v44, %v771_v51 }
  0xea   :  { %v510_v33 = vadd.f32 %v509_v31, %v476_v38  ;;  %v759_v46 = vand.u32 4294901760, %v758_v40 }
  0xeb   :  { %v773_v57 = vand.u32 4294901760, %v772_v55 }
  0xec   :  { %v519_v37 = vmax.f32 %v510_v33, 0.0  ;;  %v760_v50 = vsub.f32 %v758_v40, %v759_v46 }
  0xee   :  { %v722_v43 = vand.u32 4294901760, %v519_v37  ;;  %v761_v54 = vand.u32 4294901760, %v760_v50 }
  0xf0   :  { %v752_v45 = vsub.f32 %v519_v37, %v722_v43  ;;  %723 = vmatpush.msra.mxu2 %v722_v43  ;;  %823 = vmatpush.msrb.mxu1 %v722_v43 }
  0xf2   :  { %v753_v47 = vand.u32 4294901760, %v752_v45  ;;  %725 = vmatpush.msra.mxu2 %v724_v35  ;;  %794 = vmatpush.msrb.mxu0 %v752_v45 }
  0xf3   :  { %825 = vmatpush.msrb.mxu1 %v724_v35 }
  0xf4   :  { %v754_v49 = vsub.f32 %v752_v45, %v753_v47  ;;  %727 = vmatpush.msra.mxu2 %v726_v32  ;;  %797 = vmatpush.msrb.mxu0 %v758_v40 }
  0xf5   :  { %827 = vmatpush.msrb.mxu1 %v726_v32 }
  0xf6   :  { %729 = vmatpush.msra.mxu2 %v728_v39  ;;  %800 = vmatpush.msrb.mxu0 %v764_v41  ;;  %v755_v52 = vand.u32 4294901760, %v754_v49 }
  0xf7   :  { %829 = vmatpush.msrb.mxu1 %v728_v39  ;;  %735 = vmatmul.f32.vlgmr.msra.gmra.mxu2 %v1140_v60 }
  0xf8   :  { %852 = vmatpush.msrb.mxu2 %v753_v47  ;;  %756 = vmatpush.msra.mxu3 %v755_v52 }
  0xf9   :  { %803 = vmatpush.msrb.mxu0 %v770_v44  ;;  %833 = vmatmul.f32.vlgmr.msrb.gmra.mxu1 %v1128_v42 }
  0xfa   :  { %856 = vmatpush.msrb.mxu2 %v759_v46  ;;  %806 = vmatmul.f32.vlgmr.msrb.gmra.mxu0 %v1121_v36 }
  0xfb   :  { %762 = vmatpush.msra.mxu3 %v761_v54 }
  0xfc   :  { %860 = vmatpush.msrb.mxu2 %v765_v48 }
  0xfd   :  { %768 = vmatpush.msra.mxu3 %v767_v56 }
  0xfe   :  { %864 = vmatpush.msrb.mxu2 %v771_v51 }
  0xff   :  { %774 = vmatpush.msra.mxu3 %v773_v57  ;;  %866 = vmatmul.f32.vlgmr.msrb.gmra.mxu2 %v1110_v26 }
 0x100   :  { %776 = vmatmul.f32.vlgmr.msra.gmra.mxu3 %v1110_v26 }
 0x101   :  { %883 = vmatpush.msrb.mxu3 %v722_v43 }
 0x103   :  { %885 = vmatpush.msrb.mxu3 %v724_v35 }
 0x105   :  { %887 = vmatpush.msrb.mxu3 %v726_v32 }
 0x107   :  { %889 = vmatpush.msrb.mxu3 %v728_v39 }
 0x108   :  { %891 = vmatmul.f32.vlgmr.msrb.gmra.mxu3 %v1110_v26 }
 0x150   :  { %v551_v36 = vpop.f32.mrf.mxu0 }
 0x158   :  { %v649_v63 = vpop.f32.mrf.mxu3  ;;  %v682_v0 = vpop.f32.mrf.mxu0 }
 0x159   :  { %v592_v61 = vpop.f32.mrf.mxu1  ;;  %v622_v60 = vpop.f32.mrf.mxu2 }
 0x15a   :  { %v593_v62 = vadd.f32 %v592_v61, %v551_v36 }
 0x15c   :  { %v623_v42 = vadd.f32 %v622_v60, %v593_v62 }
 0x15e   :  { %v650_v1 = vadd.f32 %v649_v63, %v623_v42 }
 0x160   :  { %v683_v4 = vadd.f32 %v682_v0, %v650_v1 }
 0x161   :  { %v707_v5 = vpop.f32.mrf.mxu1 }
 0x162   :  { %v708_v6 = vadd.f32 %v707_v5, %v683_v4 }
 0x164   :  { %v896_v7 = vsel %vm895_vm2, %v708_v6, -inf }
 0x165   :  { %v897_v8 = vrot.slane %v896_v7, 4 }
 0x167   :  { %v898_v2 = vmax.f32 %v896_v7, %v897_v8 }
 0x169   :  { %v899_v3 = vrot.slane %v898_v2, 2 }
 0x16b   :  { %v900_v9 = vmax.f32 %v898_v2, %v899_v3 }
 0x16d   :  { %v901_v10 = vrot.slane %v900_v9, 1 }
 0x16f   :  { %v902_v26 = vmax.f32 %v900_v9, %v901_v10 }
 0x171   :  { %v910_v11 = vsub.f32 %v708_v6, %v902_v26 }
 0x173   :  { %v912_v59 = vmul.f32 1.442695, %v910_v11 }
 0x175   :  { %983 = vpow2.f32 %v912_v59 }
 0x176   :  { %v834_v16 = vpop.f32.mrf.mxu1 }
 0x177   :  { %v807_v13 = vpop.f32.mrf.mxu0 }
 0x17a   :  { %v736_v58 = vpop.f32.mrf.mxu2 }
 0x17b   :  { %v1168_v15 = vpop.eup %983 }
 0x17c   :  { %v916_v22 = vsel %vm895_vm2, %v1168_v15, 0.0 }
 0x17d   :  { %v917_v25 = vrot.slane %v916_v22, 4 }
 0x17f   :  { %v918_v29 = vadd.f32 %v917_v25, %v916_v22 }
 0x181   :  { %v919_v34 = vrot.slane %v918_v29, 2 }
 0x182   :  { %v867_v19 = vpop.f32.mrf.mxu2 }
 0x183   :  { %v777_v12 = vpop.f32.mrf.mxu3  ;;  %v920_v32 = vadd.f32 %v919_v34, %v918_v29 }
 0x184   :  { %v778_v14 = vadd.f32 %v777_v12, %v736_v58 }
 0x185   :  { %v921_v40 = vrot.slane %v920_v32, 1 }
 0x186   :  { %v808_v18 = vadd.f32 %v807_v13, %v778_v14 }
 0x187   :  { %v922_v37 = vadd.f32 %v921_v40, %v920_v32 }
 0x188   :  { %v835_v20 = vadd.f32 %v834_v16, %v808_v18 }
 0x189   :  { %vm935_vm3 = vweird.f32 %v922_v37  ;;  %v941_v36 = vand.u32 2147483648, %v922_v37  ;;  %v939_v60 = vand.u32 2147483647, %v922_v37 }
 0x18a   :  { %v868_v17 = vadd.f32 %v867_v19, %v835_v20 }
 0x18b   :  { %v892_v21 = vpop.f32.mrf.mxu3  ;;  %v942_v1 = vor.u32 1.1754944e-38, %v941_v36  ;;  %vm940_vm9 = vcmp.eq.f32.partialorder %v939_v60, 8.507059e+37 }
 0x18c   :  { %v893_v23 = vadd.f32 %v892_v21, %v868_v17 }
 0x18e   :  { %v903_v24 = vsel %vm895_vm2, %v893_v23, -inf }
 0x18f   :  { %v904_v27 = vrot.slane %v903_v24, 4 }
 0x191   :  { %v905_v28 = vmax.f32 %v903_v24, %v904_v27 }
 0x193   :  { %v906_v30 = vrot.slane %v905_v28, 2 }
 0x195   :  { %v907_v31 = vmax.f32 %v905_v28, %v906_v30 }
 0x197   :  { %v908_v35 = vrot.slane %v907_v31, 1 }
 0x199   :  { %v909_v38 = vmax.f32 %v907_v31, %v908_v35 }
 0x19b   :  { %v911_v33 = vsub.f32 %v893_v23, %v909_v38 }
 0x19d   :  { %v914_v39 = vmul.f32 1.442695, %v911_v33 }
 0x19f   :  { %985 = vpow2.f32 %v914_v39 }
 0x1a0   :  { %987 = vrcp.f32 %v922_v37 }
 0x1a5   :  { %v986_v41 = vpop.eup %985 }
 0x1a6   :  { %v923_v43 = vsel %vm895_vm2, %v986_v41, 0.0  ;;  %v988_v47 = vpop.eup %987 }
 0x1a7   :  { %v924_v44 = vrot.slane %v923_v43, 4  ;;  %v931_v50 = vmul.f32 %v988_v47, %v922_v37  ;;  %vm936_vm4 = vweird.f32 %v988_v47 }
 0x1a8   :  { %vm937_vm6 = vmor %vm935_vm3, %vm936_vm4 }
 0x1a9   :  { %v925_v45 = vadd.f32 %v924_v44, %v923_v43  ;;  %v932_v52 = vsub.f32 1.0, %v931_v50 }
 0x1ab   :  { %v926_v46 = vrot.slane %v925_v45, 2  ;;  %v933_v53 = vmul.f32 %v988_v47, %v932_v52 }
 0x1ad   :  { %v927_v48 = vadd.f32 %v926_v46, %v925_v45  ;;  %v934_v56 = vadd.f32 %v988_v47, %v933_v53 }
 0x1af   :  { %v928_v49 = vrot.slane %v927_v48, 1  ;;  %v938_v42 = vsel %vm937_vm6, %v988_v47, %v934_v56 }
 0x1b0   :  { %v943_v6 = vsel %vm940_vm9, %v942_v1, %v938_v42 }
 0x1b1   :  { %v929_v51 = vadd.f32 %v928_v49, %v927_v48  ;;  %v944_v2 = vmul.f32 %v1168_v15, %v943_v6 }
 0x1b3   :  { %989 = vrcp.f32 %v929_v51  ;;  %v956_v61 = vand.u32 2147483648, %v929_v51  ;;  %v954_v63 = vand.u32 2147483647, %v929_v51  ;;  %vm950_vm7 = vweird.f32 %v929_v51 }
 0x1b5   :  { %v957_v4 = vor.u32 1.1754944e-38, %v956_v61  ;;  %vm955_vm10 = vcmp.eq.f32.partialorder %v954_v63, 8.507059e+37 }
 0x1b9   :  { %v990_v54 = vpop.eup %989 }
 0x1ba   :  { %v946_v55 = vmul.f32 %v990_v54, %v929_v51  ;;  %vm951_vm5 = vweird.f32 %v990_v54 }
 0x1bb   :  { %vm952_vm8 = vmor %vm950_vm7, %vm951_vm5 }
 0x1bc   :  { %v947_v57 = vsub.f32 1.0, %v946_v55 }
 0x1be   :  { %v948_v62 = vmul.f32 %v990_v54, %v947_v57 }
 0x1c0   :  { %v949_v0 = vadd.f32 %v990_v54, %v948_v62 }
 0x1c2   :  { %v953_v5 = vsel %vm952_vm8, %v990_v54, %v949_v0 }
 0x1c3   :  { %v958_v7 = vsel %vm955_vm10, %v957_v4, %v953_v5 }
 0x1c4   :  { %v959_v8 = vmul.f32 %v986_v41, %v958_v7 }
 0x1c6   :  { %v962_v3 = vrot.slane %v959_v8, 6 }
 0x1c8   :  { %v963_v9 = vsel %vm895_vm2, %v944_v2, %v962_v3 }
 0x1c9   :  { %965 = vst [vmem:[#allocation2] sm:$0xf] %v963_v9 }
 0x1ca   :  { %976 = dma.vmem_to_hbm [thread:$0]  %s972_s24, 64, %s974_s27, [#allocation3]  }
 0x1cb   :  { %1015 = dma.done.wait [#allocation3], 64  }
 0x1cc   :  { %1016 = vsyncadd [#allocation3], 4294967232 }
 0x1cd   :  { %981 = vsyncpa [#allocation3], 1 }

</bundles_post_ra>
